<compile_context>
chip_gen: v7x
topology: tpu7x:2x2x1
jax: 0.10.0
libtpu: 0.0.40
codegen_flags: <defaults>
</compile_context>

<pallas_src>
import jax
import jax.numpy as jnp
from jax.experimental import pallas as pl
from jax.experimental.pallas import tpu as pltpu


def _round_up(x: int, m: int) -> int:
    return ((x + m - 1) // m) * m


def _cdiv(a: int, b: int) -> int:
    return (a + b - 1) // b


def _linear_kernel(x_ref, w_ref, b_ref, o_ref):
    # x_ref: (TB, K_pad) in input_dtype, w_ref: (K_pad, N_pad) in input_dtype,
    # b_ref: (1, N_pad) f32, o_ref: (TB, N_pad) f32.
    # Contraction is x dim 1 against weight dim 0 -> plain MXU matmul,
    # f32 accumulation, f32 bias add.
    acc = jnp.dot(x_ref[...], w_ref[...], preferred_element_type=jnp.float32)
    o_ref[...] = (acc + b_ref[...]).astype(o_ref.dtype)


def emotion_classifier_forward(x, weight, bias, *,
                               input_dtype=jnp.bfloat16,
                               vmem_budget_bytes=20 * 1024 * 1024):
    """Forward pass of EmotionClassifier.

    x:      (B, input_dim)            float32
    weight: (num_classes, input_dim)  (PyTorch nn.Linear layout)
    bias:   (num_classes,)
    returns (B, num_classes) float32
    """
    B, K = x.shape
    N, Kw = weight.shape
    assert Kw == K and bias.shape == (N,)

    in_bytes = jnp.dtype(input_dtype).itemsize
    out_bytes = 4  # f32 output

    # ---- Lane-dense contraction dim -------------------------------------
    K_pad = _round_up(K, 128)

    # ---- Class/output dim: pad to 128 lanes only when K is large enough
    # that the extra writeback is negligible; otherwise keep true N. --------
    if N % 128 == 0:
        N_pad = N
    elif K_pad > 256:
        N_pad = _round_up(N, 128)
    else:
        N_pad = N

    # ---- Tile size from an explicit VMEM budget --------------------------
    # weight + bias resident (double-buffered by the default pipeline),
    # x and out double-buffered per batch tile.
    fixed = 2 * K_pad * N_pad * in_bytes + 2 * N_pad * 4
    per_row = 2 * K_pad * in_bytes + 2 * N_pad * out_bytes
    avail = max(vmem_budget_bytes - fixed, 8 * per_row)
    tb_max = max(8, (avail // per_row) // 8 * 8)
    tb_max = min(tb_max, 1024)  # ~HBM roofline at 512-1024 rows; more adds little

    # ---- Batch tiling: padding capped at one tail tile, >=2 (even) steps
    # when the batch is big enough (v7x dual-TensorCore split). -------------
    B_sub = _round_up(B, 8)
    tb = max(8, min(tb_max, B_sub))
    n_steps = _cdiv(B_sub, tb)
    if B_sub >= 16:
        n_steps = max(n_steps, 2)
        if n_steps % 2:
            n_steps += 1
        tb = _round_up(_cdiv(B_sub, n_steps), 8)
        n_steps = _cdiv(B_sub, tb)
    b_pad = n_steps * tb

    # ---- Pad + cast operands (zero padding is exact for the dot). ---------
    x_p = x
    if b_pad != B or K_pad != K:
        x_p = jnp.pad(x, ((0, b_pad - B), (0, K_pad - K)))
    w_p = weight
    if N_pad != N or K_pad != K:
        w_p = jnp.pad(weight, ((0, N_pad - N), (0, K_pad - K)))
    b_p = bias if N_pad == N else jnp.pad(bias, (0, N_pad - N))

    x_in = x_p.astype(input_dtype)
    # One-time relayout to (K_pad, N_pad): a single HLO transpose of a tiny
    # tensor, amortized across every batch tile; kernel needs no transpose.
    w_in = jnp.transpose(w_p).astype(input_dtype)
    b_in = b_p.astype(jnp.float32).reshape(1, N_pad)

    # ---- VMEM limit: estimated need with headroom, within every chip. -----
    est = fixed + tb * per_row
    vmem_limit = int(min(64 * 1024 * 1024, max(32 * 1024 * 1024, (3 * est) // 2)))

    grid = (b_pad // tb,)

    out = pl.pallas_call(
        _linear_kernel,
        # Output dtype is f32 explicitly (does NOT inherit the bf16 input dtype).
        out_shape=jax.ShapeDtypeStruct((b_pad, N_pad), jnp.float32),
        grid_spec=pltpu.PrefetchScalarGridSpec(
            num_scalar_prefetch=0,
            grid=grid,
            in_specs=[
                # x: tiled along the batch axis (double-buffered by the pipeline).
                pl.BlockSpec((tb, K_pad), lambda i: (i, 0)),
                # weight / bias: constant index_map -> VMEM-resident across steps.
                pl.BlockSpec((K_pad, N_pad), lambda i: (0, 0)),
                pl.BlockSpec((1, N_pad), lambda i: (0, 0)),
            ],
            out_specs=pl.BlockSpec((tb, N_pad), lambda i: (i, 0)),
        ),
        compiler_params=pltpu.CompilerParams(
            # Independent batch tiles: split across v7x's two TensorCores;
            # harmless serial loop on v5e/v6e.
            dimension_semantics=("parallel",),
            vmem_limit_bytes=vmem_limit,
        ),
    )(x_in, w_in, b_in)

    # Strip batch and class padding.
    return out[:B, :N]


if __name__ == "__main__":
    # Small shapes consistent with the module's forward: x (batch, input_dim).
    batch, input_dim, num_classes = 2, 32, 8

    key = jax.random.PRNGKey(0)
    kx, kw, kb = jax.random.split(key, 3)

    x = jax.random.normal(kx, (batch, input_dim), dtype=jnp.float32)
    # Deterministic init mimicking nn.Linear uniform(-1/sqrt(fan_in), 1/sqrt(fan_in)).
    bound = 1.0 / (input_dim ** 0.5)
    weight = jax.random.uniform(kw, (num_classes, input_dim), dtype=jnp.float32,
                                minval=-bound, maxval=bound)
    bias = jax.random.uniform(kb, (num_classes,), dtype=jnp.float32,
                              minval=-bound, maxval=bound)

    ref = x @ weight.T + bias

    # Default (bf16-input, f32-accumulate) path.
    out = emotion_classifier_forward(x, weight, bias)
    out = jax.block_until_ready(out)
    assert out.shape == (batch, num_classes)
    assert out.dtype == jnp.float32
    assert jnp.allclose(out, ref, atol=2e-2, rtol=2e-2)  # bf16 input precision

    # Exact-f32 path for strict parity with the PyTorch reference.
    out_f32 = emotion_classifier_forward(x, weight, bias, input_dtype=jnp.float32)
    out_f32 = jax.block_until_ready(out_f32)
    assert jnp.allclose(out_f32, ref, atol=1e-5, rtol=1e-5)

    print("KERNEL_OK")
</pallas_src>

<mosaic_0001>
module attributes {stable_mosaic.version = 11 : i64} {
  func.func @_linear_kernel(%arg0: i32, %arg1: memref<8x128xbf16, #tpu.memory_space<vmem>>, %arg2: memref<128x8xbf16, #tpu.memory_space<vmem>>, %arg3: memref<1x8xf32, #tpu.memory_space<vmem>>, %arg4: memref<8x8xf32, #tpu.memory_space<vmem>>) attributes {dimension_semantics = [#tpu.dimension_semantics<parallel>], iteration_bounds = array<i64: 1>, scalar_prefetch = 0 : i64, scratch_operands = 0 : i64, tpu.core_type = #tpu.core_type<tc>, window_params = [{transform_indices = @transform_0, window_bounds = array<i64: 8, 128>}, {pipeline_mode = #tpu.pipeline_mode<synchronous>, transform_indices = @transform_1, window_bounds = array<i64: 128, 8>}, {pipeline_mode = #tpu.pipeline_mode<synchronous>, transform_indices = @transform_2, window_bounds = array<i64: 1, 8>}, {transform_indices = @transform_3, window_bounds = array<i64: 8, 8>}]} {
    %c0 = arith.constant 0 : index
    %c0_0 = arith.constant 0 : index
    %0 = vector.load %arg1[%c0, %c0_0] : memref<8x128xbf16, #tpu.memory_space<vmem>>, vector<8x128xbf16>
    %c0_1 = arith.constant 0 : index
    %c0_2 = arith.constant 0 : index
    %1 = vector.load %arg2[%c0_1, %c0_2] : memref<128x8xbf16, #tpu.memory_space<vmem>>, vector<128x8xbf16>
    %cst = arith.constant dense<0.000000e+00> : vector<8x8xf32>
    %2 = tpu.matmul %0, %1, %cst {dimension_numbers = #tpu.dot_dimension_numbers<[1], [0], [0], [1], [0, 0, 1, 1], [], []>} : vector<8x128xbf16>, vector<128x8xbf16>, vector<8x8xf32> -> vector<8x8xf32>
    %c0_3 = arith.constant 0 : index
    %c0_4 = arith.constant 0 : index
    %3 = vector.load %arg3[%c0_3, %c0_4] : memref<1x8xf32, #tpu.memory_space<vmem>>, vector<1x8xf32>
    %4 = vector.broadcast %3 : vector<1x8xf32> to vector<8x8xf32>
    %5 = arith.addf %2, %4 : vector<8x8xf32>
    %c0_5 = arith.constant 0 : index
    %c0_6 = arith.constant 0 : index
    %6 = vector.load %arg4[%c0_5, %c0_6] : memref<8x8xf32, #tpu.memory_space<vmem>>, vector<8x8xf32>
    tpu.vector_store %arg4[%c0_5, %c0_6], %5 {strides = array<i32>} : memref<8x8xf32, #tpu.memory_space<vmem>>, vector<8x8xf32>,
    return
  }
  func.func @transform_0(%arg0: i32) -> (i32, i32) {
    %c0_i32 = arith.constant 0 : i32
    %c0_i32_0 = arith.constant 0 : i32
    return %arg0, %c0_i32 : i32, i32
  }
  func.func @transform_1(%arg0: i32) -> (i32, i32) {
    %c0_i32 = arith.constant 0 : i32
    %c0_i32_0 = arith.constant 0 : i32
    %c0_i32_1 = arith.constant 0 : i32
    return %c0_i32, %c0_i32_0 : i32, i32
  }
  func.func @transform_2(%arg0: i32) -> (i32, i32) {
    %c0_i32 = arith.constant 0 : i32
    %c0_i32_0 = arith.constant 0 : i32
    %c0_i32_1 = arith.constant 0 : i32
    return %c0_i32, %c0_i32_0 : i32, i32
  }
  func.func @transform_3(%arg0: i32) -> (i32, i32) {
    %c0_i32 = arith.constant 0 : i32
    %c0_i32_0 = arith.constant 0 : i32
    return %arg0, %c0_i32 : i32, i32
  }
}

</mosaic_0001>

<bundles_post_ra>
// kernel: tpu_custom_call.1
= control target key start
LH: loop header
LB: loop body
LE: loop exit
PB: predicated region body
PF: predicated region fallthrough
CT: control target
= control target key end

     0   :  { %v217_v1 = vmov 0.0   ;;  %vm218_vm0 = vmmov 0   ;;  %s282_s0 = inlined_call_operand.vmem [shape: bf16[8,128], index: 0, kind: input, shape index: {}]   ;;  %s283_s1 = inlined_call_operand.vmem [shape: bf16[128,8], index: 1, kind: input, shape index: {}]   ;;  %s284_s2 = inlined_call_operand.vmem [shape: f32[1,8], index: 2, kind: input, shape index: {}]   ;;  %s285_s3 = inlined_call_operand.hbm [shape: f32[8,8], index: 3, kind: output, shape index: {}]  }
   0x1   :  { %v185_v0 = vld [vmem:[%s283_s1] sm:$0xff]   ;;  %162 = vmatprep.subr.bf16.mxu0 %v217_v1  ;;  %v186_v2 = vld [vmem:[%s283_s1 + $0x8] sm:$0xff]   ;;  %178 = vmatprep.mubr.msk.bf16.mxu0 %vm218_vm0, %v217_v1  ;;  %v187_v3 = vld [vmem:[%s283_s1 + $0x10] sm:$0xff]  }
   0x2   :  { %163 = vmatpush3.bf16.msra.mxu0 %v185_v0 }
   0x3   :  { %164 = vmatprep.subr.bf16.mxu0 %v217_v1 }
   0x6   :  { %165 = vmatpush3.bf16.msra.mxu0 %v186_v2 }
   0x7   :  { %166 = vmatprep.subr.bf16.mxu0 %v217_v1 }
   0x8   :  { %8 = vsyncpa [#allocation3], 0  ;;  %v188_v4 = vld [vmem:[%s283_s1 + $0x18] sm:$0xff]   ;;  %v189_v5 = vld [vmem:[%s283_s1 + $0x20] sm:$0xff]   ;;  %s219_s5 = smov [#allocation2]   ;;  %vm128_vm1 = vcmask 64512  }
   0x9   :  { %v190_v6 = vld [vmem:[%s283_s1 + $0x28] sm:$0xff]   ;;  %v191_v7 = vld [vmem:[%s283_s1 + $0x30] sm:$0xff]   ;;  %v192_v8 = vld [vmem:[%s283_s1 + $0x38] sm:$0xff]   ;;  %s136_s6 = sshll.u32 %s219_s5, 4  ;;  %s137_s6 = int_to_ptr.vmem [resolvable:$true] %s136_s6 }
   0xa   :  { %167 = vmatpush3.bf16.msra.mxu0 %v187_v3  ;;  %v16_v9 = vld [vmem:[%s282_s0] sm:$0xf]  ;;  %s193_s1 = scalar_lea.vmem %s137_s6, 128  ;;  %p198_p1 = scmp.lt.s32.totalorder %s137_s6, %s137_s6 }
   0xb   :  { %168 = vmatprep.subr.bf16.mxu0 %v217_v1  ;;  %v144_v10 = vld [vmem:[%s284_s2] ss:$0 sm:$0xff]  ;;  %p194_p0 = scmp.ne.s32.totalorder %s137_s6, %s193_s1  ;;  %p199_p2 = scmp.lt.s32.totalorder %s193_s1, %s193_s1 }
   0xd   :  { %p200_p3 = por %p199_p2, %p198_p1 }
   0xe   :  { %169 = vmatpush3.bf16.msra.mxu0 %v188_v4 }
   0xf   :  { %170 = vmatprep.subr.bf16.mxu0 %v217_v1  ;;  %p201_p4 = pnand %p200_p3, %p194_p0 }
  0x12   :  { %171 = vmatpush3.bf16.msra.mxu0 %v189_v5 }
  0x13   :  { %172 = vmatprep.subr.bf16.mxu0 %v217_v1 }
  0x16   :  { %173 = vmatpush3.bf16.msra.mxu0 %v190_v6 }
  0x17   :  { %174 = vmatprep.subr.bf16.mxu0 %v217_v1 }
  0x1a   :  { %175 = vmatpush3.bf16.msra.mxu0 %v191_v7 }
  0x1b   :  { %176 = vmatprep.subr.bf16.mxu0 %v217_v1 }
  0x1e   :  { %177 = vmatpush3.bf16.msra.mxu0 %v192_v8 }
  0x21   :  { %179 = vmatmul.mubr.bf16.vlgmr.msra.gmra.mrb[0].mxu0 %v16_v9 }
  0xf4   :  { %v122_v11 = vpop.f32.mrb[0].mxu0 }
  0xf5   :  { %v123_v12 = vadd.f32 %v144_v10, %v122_v11  ;;  %v180_v13 = vpop.f32.mrb[1].mxu0 }
  0xf6   :  { %v125_v14 = vpop.f32.mrb[2].mxu0 }
  0xf7   :  { %v181_v15 = vpop.f32.mrb[3].mxu0  ;;  %129 = vst.msk [vmem:[#allocation2] sm:$0xff] %vm128_vm1, %v123_v12 }
  0xf8   :  { %204 = shalt.err (!%p201_p4)
}
  0xf9   :  { %s205_s2 = scalar_lea.hbm %s285_s3, 128 }
  0xfa   :  { %p206_p5 = scmp.ne.s32.totalorder %s285_s3, %s205_s2  ;;  %p209_p6 = scmp.lt.u32.totalorder %s205_s2, %s285_s3 }
  0xfc   :  { %p211_p7 = pnand %p209_p6, %p206_p5 }
  0xfe   :  { %214 = shalt.err (!%p211_p7)
}
  0xff   :  { %139 = dma.vmem_to_hbm [thread:$0]  %s137_s6, 128, %s285_s3, [#allocation3]  }
 0x100   :  { %215 = dma.done.wait [#allocation3], 128  }
 0x101   :  { %216 = vsyncadd [#allocation3], 4294967168 }
 0x102   :  { %143 = vsyncpa [#allocation3], 1 }

</bundles_post_ra>
